<compile_context>
chip_gen: v7x
topology: tpu7x:2x2x1
jax: 0.10.0
libtpu: 0.0.40
codegen_flags: <defaults>
</compile_context>

<pallas_src>
import functools
import math

import jax
import jax.numpy as jnp
from jax import lax
from jax.experimental import pallas as pl
from jax.experimental.pallas import tpu as pltpu

EPS = 1e-12  # F.normalize default eps (applied to the norm)


def _rmsnorm_kernel(x_ref, o_ref, *, scale, eps2):
    """Unpacked path: one logical row per lane row."""
    x = x_ref[...].astype(jnp.float32)
    ss = jnp.sum(x * x, axis=-1, keepdims=True)              # (rt, 1)
    inv = scale * lax.rsqrt(jnp.maximum(ss, eps2))            # == scale / max(||x||, eps)
    o_ref[...] = (x * inv).astype(o_ref.dtype)


def _rmsnorm_packed_kernel(x_ref, b_ref, o_ref, *, scale, eps2):
    """Lane-packed path: `groups` logical rows share one packed_dim-lane row.

    Per-group sums of squares are computed with a single MXU matmul against a
    constant block-diagonal ones matrix B (segment-sum broadcast back to every
    lane of its group), then one full-width rsqrt on the EUP.
    """
    x = x_ref[...].astype(jnp.float32)
    xsq = x * x
    ss = jnp.dot(xsq, b_ref[...],
                 preferred_element_type=jnp.float32,
                 precision=jax.lax.Precision.HIGHEST)          # (rt, packed_dim) group sums
    inv = scale * lax.rsqrt(jnp.maximum(ss, eps2))
    o_ref[...] = (x * inv).astype(o_ref.dtype)


def _vmem_capacity_bytes() -> int:
    try:
        return int(pltpu.get_tpu_info().vmem_capacity_bytes)
    except Exception:
        return 64 * 1024 * 1024  # conservative: assume v7x-sized VMEM


def _choose_row_tile(packed_rows: int, packed_dim: int, itemsize: int,
                     target_block_bytes: int) -> int:
    """Largest sublane-aligned row tile ~target_block_bytes, with >=2 grid steps."""
    if packed_rows < 16:
        return packed_rows                      # single full-extent block
    bytes_per_row = max(1, packed_dim * itemsize)
    tile = int(target_block_bytes // bytes_per_row)
    align = max(8, 32 // max(1, itemsize))      # f32:8, bf16:16, int8/fp8:32 sublane packing
    tile = max(align, min(tile, 32768))
    tile -= tile % align
    # Guarantee >=2 grid steps so ("parallel",) can shard across both TCs on v7x;
    # one extra ~0.35us step is noise on 1-TC v5e/v6e.
    half = -(-packed_rows // 2)
    half = -(-half // align) * align
    tile = min(tile, half)
    return max(align, tile)


def simple_rms_norm(x: jax.Array, *, target_block_bytes: int | None = None) -> jax.Array:
    """Equivalent of SimpleRMSNorm(dim).forward(x): F.normalize(x, dim=-1) * dim**0.5."""
    orig_shape = x.shape
    dim = int(orig_shape[-1])
    scale = float(dim) ** 0.5
    rows = math.prod(orig_shape[:-1]) if len(orig_shape) > 1 else 1

    # Generation-aware budgets: v7x has 64 MiB VMEM/TC and 2 TCs; v5e/v6e have 128 MiB.
    small_vmem = _vmem_capacity_bytes() <= 64 * 1024 * 1024
    if target_block_bytes is None:
        target_block_bytes = (4 if small_vmem else 8) * 1024 * 1024
    vmem_limit = (48 if small_vmem else 100) * 1024 * 1024

    # Lane packing: put groups = lcm(dim,128)//dim logical rows on one lane-dense row
    # (dense vst instead of masked vst.msk). Cap packed_dim so B stays small.
    groups = 1
    g = math.lcm(dim, 128) // dim
    if g > 1 and rows % g == 0 and g * dim <= 512:
        groups = g
    packed_dim = groups * dim
    packed_rows = max(1, rows // groups)
    x2 = x.reshape(packed_rows, packed_dim)      # pure row-major reshape (no data movement)

    itemsize = x.dtype.itemsize
    row_tile = _choose_row_tile(packed_rows, packed_dim, itemsize, target_block_bytes)
    grid = (pl.cdiv(packed_rows, row_tile),)     # last partial block is read-padded/store-masked
    # TODO(synk): a dim too large for even an (8, dim) VMEM block would need a split-dim two-pass reduction.

    eps2 = EPS * EPS
    if groups == 1:
        kernel = functools.partial(_rmsnorm_kernel, scale=scale, eps2=eps2)
        in_specs = [pl.BlockSpec((row_tile, packed_dim), lambda i: (i, 0))]
        operands = (x2,)
        extra_flops = 0
    else:
        kernel = functools.partial(_rmsnorm_packed_kernel, scale=scale, eps2=eps2)
        seg = jnp.arange(packed_dim, dtype=jnp.int32) // dim
        bdiag = (seg[:, None] == seg[None, :]).astype(jnp.float32)   # (pd, pd) block-diagonal ones
        in_specs = [pl.BlockSpec((row_tile, packed_dim), lambda i: (i, 0)),
                    pl.BlockSpec((packed_dim, packed_dim), lambda i: (0, 0))]
        operands = (x2, bdiag)
        extra_flops = 2 * packed_rows * packed_dim * packed_dim

    out = pl.pallas_call(
        kernel,
        out_shape=jax.ShapeDtypeStruct((packed_rows, packed_dim), x.dtype),
        grid=grid,
        in_specs=in_specs,
        out_specs=pl.BlockSpec((row_tile, packed_dim), lambda i: (i, 0)),
        compiler_params=pltpu.CompilerParams(
            # Row blocks are independent -> shard the grid across TensorCores.
            dimension_semantics=("parallel",),
            vmem_limit_bytes=vmem_limit,
        ),
        cost_estimate=pl.CostEstimate(
            flops=3 * rows * dim + extra_flops,
            transcendentals=rows,
            bytes_accessed=2 * rows * dim * itemsize,
        ),
    )(*operands)

    return out.reshape(orig_shape)


if __name__ == "__main__":
    key = jax.random.PRNGKey(0)
    k1, k2, k3 = jax.random.split(key, 3)

    def reference(x):
        xf = x.astype(jnp.float32)
        n = jnp.maximum(jnp.linalg.norm(xf, axis=-1, keepdims=True), EPS)
        return (xf / n * (x.shape[-1] ** 0.5)).astype(x.dtype)

    # Case 1: small hidden -> lane-packed MXU segment-sum path (groups=4, packed_dim=128).
    x1 = jax.random.normal(k1, (2, 8, 32), dtype=jnp.float32)
    y1 = simple_rms_norm(x1)
    jax.block_until_ready(y1)
    assert y1.shape == x1.shape and y1.dtype == x1.dtype
    assert jnp.allclose(y1, reference(x1), atol=1e-4, rtol=1e-4), "mismatch (packed path, dim=32)"

    # Case 2: dim multiple of 128, odd row count -> unpacked full-extent block.
    x2 = jax.random.normal(k2, (3, 5, 256), dtype=jnp.float32)
    y2 = simple_rms_norm(x2)
    jax.block_until_ready(y2)
    assert jnp.allclose(y2, reference(x2), atol=1e-4, rtol=1e-4), "mismatch (unpacked path, dim=256)"

    # Case 3: dim=96 -> generalized lcm packing (groups=4, packed_dim=384).
    x3 = jax.random.normal(k3, (4, 6, 96), dtype=jnp.float32)
    y3 = simple_rms_norm(x3)
    jax.block_until_ready(y3)
    assert jnp.allclose(y3, reference(x3), atol=1e-4, rtol=1e-4), "mismatch (packed path, dim=96)"

    print("KERNEL_OK")
</pallas_src>

<mosaic_0001>
module attributes {stable_mosaic.version = 11 : i64} {
  func.func @_rmsnorm_packed_kernel(%arg0: i32, %arg1: memref<4x128xf32, #tpu.memory_space<vmem>>, %arg2: memref<128x128xf32, #tpu.memory_space<vmem>>, %arg3: memref<4x128xf32, #tpu.memory_space<vmem>>) attributes {dimension_semantics = [#tpu.dimension_semantics<parallel>], iteration_bounds = array<i64: 1>, scalar_prefetch = 0 : i64, scratch_operands = 0 : i64, tpu.core_type = #tpu.core_type<tc>, window_params = [{transform_indices = @transform_0, window_bounds = array<i64: 4, 128>}, {pipeline_mode = #tpu.pipeline_mode<synchronous>, transform_indices = @transform_1, window_bounds = array<i64: 128, 128>}, {transform_indices = @transform_2, window_bounds = array<i64: 4, 128>}]} {
    %c0 = arith.constant 0 : index
    %c0_0 = arith.constant 0 : index
    %0 = vector.load %arg1[%c0, %c0_0] : memref<4x128xf32, #tpu.memory_space<vmem>>, vector<4x128xf32>
    %1 = arith.mulf %0, %0 : vector<4x128xf32>
    %c0_1 = arith.constant 0 : index
    %c0_2 = arith.constant 0 : index
    %2 = vector.load %arg2[%c0_1, %c0_2] : memref<128x128xf32, #tpu.memory_space<vmem>>, vector<128x128xf32>
    %cst = arith.constant dense<0.000000e+00> : vector<4x128xf32>
    %3 = tpu.matmul %1, %2, %cst {dimension_numbers = #tpu.dot_dimension_numbers<[1], [0], [0], [1], [0, 0, 1, 1], [], []>, precision = #tpu.contract_precision<fp32>} : vector<4x128xf32>, vector<128x128xf32>, vector<4x128xf32> -> vector<4x128xf32>
    %cst_3 = arith.constant 1.000000e-24 : f32
    %4 = vector.broadcast %cst_3 : f32 to vector<4x128xf32>
    %5 = arith.maximumf %3, %4 : vector<4x128xf32>
    %6 = math.rsqrt %5 : vector<4x128xf32>
    %cst_4 = arith.constant 5.65685415 : f32
    %7 = vector.broadcast %cst_4 : f32 to vector<4x128xf32>
    %8 = arith.mulf %7, %6 : vector<4x128xf32>
    %9 = arith.mulf %0, %8 : vector<4x128xf32>
    %c0_5 = arith.constant 0 : index
    %c0_6 = arith.constant 0 : index
    %10 = vector.load %arg3[%c0_5, %c0_6] : memref<4x128xf32, #tpu.memory_space<vmem>>, vector<4x128xf32>
    tpu.vector_store %arg3[%c0_5, %c0_6], %9 {strides = array<i32>} : memref<4x128xf32, #tpu.memory_space<vmem>>, vector<4x128xf32>,
    return
  }
  func.func @transform_0(%arg0: i32) -> (i32, i32) {
    %c0_i32 = arith.constant 0 : i32
    %c0_i32_0 = arith.constant 0 : i32
    return %arg0, %c0_i32 : i32, i32
  }
  func.func @transform_1(%arg0: i32) -> (i32, i32) {
    %c0_i32 = arith.constant 0 : i32
    %c0_i32_0 = arith.constant 0 : i32
    %c0_i32_1 = arith.constant 0 : i32
    return %c0_i32, %c0_i32_0 : i32, i32
  }
  func.func @transform_2(%arg0: i32) -> (i32, i32) {
    %c0_i32 = arith.constant 0 : i32
    %c0_i32_0 = arith.constant 0 : i32
    return %arg0, %c0_i32 : i32, i32
  }
}

</mosaic_0001>

<bundles_post_ra>
// kernel: tpu_custom_call.1
= control target key start
LH: loop header
LB: loop body
LE: loop exit
PB: predicated region body
PF: predicated region fallthrough
CT: control target
= control target key end

     0   :  { %7 = vsyncpa [#allocation3], 0  ;;  %s1583_s0 = inlined_call_operand.hbm [shape: f32[4,128], index: 0, kind: input, shape index: {}]   ;;  %s1584_s1 = inlined_call_operand.hbm [shape: f32[128,128], index: 1, kind: input, shape index: {}]   ;;  %s1585_s2 = inlined_call_operand.hbm [shape: f32[4,128], index: 2, kind: output, shape index: {}]  }
   0x1   :  { %8 = vsyncpa [#allocation6], 0 }
   0x2   :  { %9 = vsyncpa [#allocation4], 0  ;;  %s1265_s9 = smov [#allocation2]   ;;  %s1266_s11 = smov [#allocation5]  }
   0x3   :  { %s16_s10 = sshll.u32 %s1265_s9, 4  ;;  %s25_s12 = sshll.u32 %s1266_s11, 4  ;;  %s17_s10 = int_to_ptr.vmem [resolvable:$true] %s16_s10  ;;  %s1288_s12 = int_to_ptr.vmem [resolvable:$true] %s25_s12 }
   0x4   :  { %s1193_s15 = scalar_lea.hbm %s1583_s0, 64 }
   0x5   :  { %p1194_p0 = scmp.ne.s32.totalorder %s1583_s0, %s1193_s15  ;;  %p1197_p1 = scmp.lt.u32.totalorder %s1193_s15, %s1583_s0 }
   0x7   :  { %p1199_p2 = pnand %p1197_p1, %p1194_p0 }
   0x9   :  { %1202 = shalt.err (!%p1199_p2)
}
   0xa   :  { %s1203_s20 = scalar_lea.vmem %s17_s10, 64  ;;  %p1208_p4 = scmp.lt.s32.totalorder %s17_s10, %s17_s10 }
   0xb   :  { %p1204_p3 = scmp.ne.s32.totalorder %s17_s10, %s1203_s20  ;;  %p1209_p5 = scmp.lt.s32.totalorder %s1203_s20, %s1203_s20 }
   0xd   :  { %p1210_p6 = por %p1209_p5, %p1208_p4 }
   0xf   :  { %p1211_p7 = pnand %p1210_p6, %p1204_p3 }
  0x11   :  { %1214 = shalt.err (!%p1211_p7)
}
  0x12   :  { %19 = dma.hbm_to_vmem [thread:$0]  %s1583_s0, 64, %s17_s10, [#allocation3]  }
  0x13   :  { %s1215_s25 = scalar_lea.hbm %s1584_s1, 2048 }
  0x14   :  { %p1216_p8 = scmp.ne.s32.totalorder %s1584_s1, %s1215_s25  ;;  %p1219_p9 = scmp.lt.u32.totalorder %s1215_s25, %s1584_s1 }
  0x16   :  { %p1221_p10 = pnand %p1219_p9, %p1216_p8 }
  0x18   :  { %1224 = shalt.err (!%p1221_p10)
}
  0x19   :  { %s1225_s30 = scalar_lea.vmem %s1288_s12, 2048  ;;  %p1230_p12 = scmp.lt.s32.totalorder %s1288_s12, %s1288_s12 }
  0x1a   :  { %p1226_p11 = scmp.ne.s32.totalorder %s1288_s12, %s1225_s30  ;;  %p1231_p13 = scmp.lt.s32.totalorder %s1225_s30, %s1225_s30 }
  0x1c   :  { %p1232_p0 = por %p1231_p13, %p1230_p12 }
  0x1e   :  { %p1233_p1 = pnand %p1232_p0, %p1226_p11 }
  0x20   :  { %1236 = shalt.err (!%p1233_p1)
}
  0x21   :  { %s1267_s0 = smov 128   ;;  %s1268_s3 = smov 8  }
  0x22   :  { %31 = dma.hbm_to_vmem [thread:$0]  %s1584_s1, 2048, %s1288_s12, [#allocation6], %s1267_s0, %s1267_s0, %s1268_s3  }
  0x23   :  { %1259 = dma.done.wait [#allocation3], 64  }
  0x24   :  { %1260 = vsyncadd [#allocation3], 4294967232 }
  0x25   :  { %1261 = dma.done.wait [#allocation6], 2048  }
  0x26   :  { %1262 = vsyncadd [#allocation6], 4294965248  ;;  %v1269_v0 = vmov 0.0|0.0   ;;  %vm1270_vm0 = vmmov 0   ;;  %v1271_v1 = vmov 0.0   ;;  %v40_v2 = vld [vmem:[#allocation5] sm:$0xff] }
  0x27   :  { %1030 = vmatprep.subr.bf16.mxu1 %v1269_v0  ;;  %1102 = vmatprep.subr.bf16.mxu0 %v1269_v0  ;;  %v41_v3 = vld [vmem:[#allocation5 + $0x8] sm:$0xff]  ;;  %v42_v4 = vld [vmem:[#allocation5 + $0x10] sm:$0xff]  ;;  %v57_v5 = vand.u32 4294901760, %v40_v2  ;;  %v43_v7 = vld [vmem:[#allocation5 + $0x18] sm:$0xff]  ;;  %s1272_s1 = smov [#allocation7]  }
  0x28   :  { %852 = vmatprep.mubr.msk.f32.mxu1 %vm1270_vm0, %v1271_v1  ;;  %957 = vmatprep.mubr.msk.f32.mxu0 %vm1270_vm0, %v1271_v1  ;;  %v60_v6 = vand.u32 4294901760, %v41_v3  ;;  %v63_v8 = vand.u32 4294901760, %v42_v4  ;;  %v66_v9 = vand.u32 4294901760, %v43_v7  ;;  %v44_v10 = vld [vmem:[#allocation5 + $0x20] sm:$0xff]  ;;  %v45_v11 = vld [vmem:[#allocation5 + $0x28] sm:$0xff]  ;;  %v46_v16 = vld [vmem:[#allocation5 + $0x30] sm:$0xff] }
  0x29   :  { %v69_v14 = vand.u32 4294901760, %v44_v10  ;;  %v72_v15 = vand.u32 4294901760, %v45_v11  ;;  %v47_v17 = vld [vmem:[#allocation5 + $0x38] sm:$0xff]  ;;  %v75_v19 = vand.u32 4294901760, %v46_v16  ;;  %v1341_v22 = vld [vmem:[#allocation5 + $0x40] sm:$0xff]  ;;  %v1343_v23 = vld [vmem:[#allocation5 + $0x48] sm:$0xff]  ;;  %v1359_v30 = vsub.f32 %v40_v2, %v57_v5 }
  0x2a   :  { %v1325_v12 = vpack.c.bf16 %v60_v6, %v57_v5  ;;  %v1329_v13 = vpack.c.bf16 %v66_v9, %v63_v8  ;;  %v78_v20 = vand.u32 4294901760, %v47_v17  ;;  %v1337_v21 = vld [vmem:[#allocation2] sm:$0xf]  ;;  %v81_v26 = vand.u32 4294901760, %v1341_v22  ;;  %v1355_v28 = vld [vmem:[#allocation5 + $0x50] sm:$0xff]  ;;  %v1371_v36 = vld [vmem:[#allocation5 + $0x60] sm:$0xff] }
  0x2b   :  { %v1335_v18 = vpack.c.bf16 %v72_v15, %v69_v14  ;;  %v39_v24 = vmul.f32 %v1337_v21, %v1337_v21  ;;  %v84_v27 = vand.u32 4294901760, %v1343_v23  ;;  %v1357_v29 = vld [vmem:[#allocation5 + $0x58] sm:$0xff]  ;;  %v1363_v32 = vsub.f32 %v41_v3, %v60_v6  ;;  %v1375_v37 = vld [vmem:[#allocation5 + $0x68] sm:$0xff]  ;;  %v1394_v44 = vld [vmem:[#allocation5 + $0x70] sm:$0xff]  ;;  %s708_s6 = sshll.u32 %s1272_s1, 4  ;;  %s709_s6 = int_to_ptr.vmem [resolvable:$true] %s708_s6 }
  0x2c   :  { %1032 = vmatpush3.bf16.msra.mxu1 %v1325_v12  ;;  %1104 = vmatpush3.bf16.msra.mxu0 %v1325_v12  ;;  %v1349_v25 = vpack.c.bf16 %v78_v20, %v75_v19  ;;  %v87_v34 = vand.u32 4294901760, %v1355_v28  ;;  %v90_v35 = vand.u32 4294901760, %v1357_v29  ;;  %v1377_v38 = vsub.f32 %v42_v4, %v63_v8  ;;  %v1396_v45 = vld [vmem:[#allocation5 + $0x78] sm:$0xff]  ;;  %s1237_s7 = scalar_lea.vmem %s709_s6, 64  ;;  %p1242_p3 = scmp.lt.s32.totalorder %s709_s6, %s709_s6 }
  0x2d   :  { %1033 = vmatprep.subr.bf16.mxu1 %v1269_v0  ;;  %1105 = vmatprep.subr.bf16.mxu0 %v1269_v0  ;;  %v1361_v31 = vand.u32 4294901760, %v39_v24  ;;  %v1367_v33 = vpack.c.bf16 %v84_v27, %v81_v26  ;;  %v1379_v39 = vsub.f32 %v43_v7, %v66_v9  ;;  %v93_v40 = vand.u32 4294901760, %v1371_v36  ;;  %p1238_p2 = scmp.ne.s32.totalorder %s709_s6, %s1237_s7  ;;  %p1243_p4 = scmp.lt.s32.totalorder %s1237_s7, %s1237_s7 }
  0x2e   :  { %v1391_v42 = vpack.c.bf16 %v90_v35, %v87_v34  ;;  %v96_v43 = vand.u32 4294901760, %v1375_v37  ;;  %v150_v46 = vand.u32 4294901760, %v1359_v30  ;;  %v157_v47 = vand.u32 4294901760, %v1363_v32 }
  0x2f   :  { %v1383_v41 = vsub.f32 %v39_v24, %v1361_v31  ;;  %v1402_v48 = vsub.f32 %v44_v10, %v69_v14  ;;  %v1404_v49 = vsub.f32 %v45_v11, %v72_v15  ;;  %v99_v50 = vand.u32 4294901760, %v1394_v44  ;;  %p1244_p5 = por %p1243_p4, %p1242_p3 }
  0x30   :  { %1035 = vmatpush3.bf16.msra.mxu1 %v1329_v13  ;;  %1107 = vmatpush3.bf16.msra.mxu0 %v1329_v13  ;;  %v102_v51 = vand.u32 4294901760, %v1396_v45  ;;  %v164_v53 = vand.u32 4294901760, %v1377_v38  ;;  %v1416_v54 = vpack.c.bf16 %v96_v43, %v93_v40  ;;  %v151_v55 = vsub.f32 %v1359_v30, %v150_v46 }
  0x31   :  { %1036 = vmatprep.subr.bf16.mxu1 %v1269_v0  ;;  %1108 = vmatprep.subr.bf16.mxu0 %v1269_v0  ;;  %v139_v52 = vand.u32 4294901760, %v1383_v41  ;;  %v158_v56 = vsub.f32 %v1363_v32, %v157_v47  ;;  %v171_v57 = vand.u32 4294901760, %v1379_v39  ;;  %v1423_v58 = vsub.f32 %v46_v16, %v75_v19  ;;  %p1245_p6 = pnand %p1244_p5, %p1238_p2 }
  0x32   :  { %v1425_v59 = vsub.f32 %v47_v17, %v78_v20  ;;  %v165_v61 = vsub.f32 %v1377_v38, %v164_v53  ;;  %v178_v62 = vand.u32 4294901760, %v1402_v48  ;;  %v185_v63 = vand.u32 4294901760, %v1404_v49 }
  0x33   :  { %v140_v60 = vsub.f32 %v1383_v41, %v139_v52  ;;  %v1437_v2 = vpack.c.bf16 %v102_v51, %v99_v50  ;;  %v152_v3 = vand.u32 4294901760, %v151_v55  ;;  %v159_v4 = vand.u32 4294901760, %v158_v56 }
  0x34   :  { %1038 = vmatpush3.bf16.msra.mxu1 %v1335_v18  ;;  %1110 = vmatpush3.bf16.msra.mxu0 %v1335_v18  ;;  %v172_v5 = vsub.f32 %v1379_v39, %v171_v57  ;;  %v1443_v6 = vsub.f32 %v1341_v22, %v81_v26  ;;  %v1446_v7 = vsub.f32 %v1343_v23, %v84_v27  ;;  %v166_v10 = vand.u32 4294901760, %v165_v61 }
  0x35   :  { %1039 = vmatprep.subr.bf16.mxu1 %v1269_v0  ;;  %1111 = vmatprep.subr.bf16.mxu0 %v1269_v0  ;;  %v1127_v8 = vpack.c.bf16 %v157_v47, %v150_v46  ;;  %v141_v9 = vand.u32 4294901760, %v140_v60  ;;  %v179_v11 = vsub.f32 %v1402_v48, %v178_v62  ;;  %v186_v14 = vsub.f32 %v1404_v49, %v185_v63 }
  0x36   :  { %v1055_v15 = vpack.c.bf16 %v159_v4, %v152_v3  ;;  %v173_v16 = vand.u32 4294901760, %v172_v5  ;;  %v192_v17 = vand.u32 4294901760, %v1423_v58  ;;  %v199_v19 = vand.u32 4294901760, %v1425_v59 }
  0x37   :  { %v1459_v20 = vsub.f32 %v1355_v28, %v87_v34  ;;  %v1464_v22 = vsub.f32 %v1357_v29, %v90_v35  ;;  %v1130_v23 = vpack.c.bf16 %v171_v57, %v164_v53  ;;  %v180_v24 = vand.u32 4294901760, %v179_v11 }
  0x38   :  { %1041 = vmatpush3.bf16.msra.mxu1 %v1349_v25  ;;  %1113 = vmatpush3.bf16.msra.mxu0 %v1349_v25  ;;  %v187_v26 = vand.u32 4294901760, %v186_v14  ;;  %v206_v27 = vand.u32 4294901760, %v1443_v6  ;;  %v1058_v46 = vpack.c.bf16 %v173_v16, %v166_v10  ;;  %v193_v47 = vsub.f32 %v1423_v58, %v192_v17 }
  0x39   :  { %1042 = vmatprep.subr.bf16.mxu1 %v1269_v0  ;;  %1114 = vmatprep.subr.bf16.mxu0 %v1269_v0  ;;  %v200_v28 = vsub.f32 %v1425_v59, %v199_v19  ;;  %v213_v34 = vand.u32 4294901760, %v1446_v7  ;;  %v1475_v29 = vsub.f32 %v1371_v36, %v93_v40  ;;  %v1480_v35 = vsub.f32 %v1375_v37, %v96_v43 }
  0x3a   :  { %v1133_v53 = vpack.c.bf16 %v185_v63, %v178_v62  ;;  %v207_v55 = vsub.f32 %v1443_v6, %v206_v27  ;;  %v220_v56 = vand.u32 4294901760, %v1459_v20  ;;  %v194_v36 = vand.u32 4294901760, %v193_v47 }
  0x3b   :  { %v201_v40 = vand.u32 4294901760, %v200_v28  ;;  %v214_v57 = vsub.f32 %v1446_v7, %v213_v34  ;;  %v227_v37 = vand.u32 4294901760, %v1464_v22  ;;  %v1495_v43 = vsub.f32 %v1394_v44, %v99_v50 }
  0x3c   :  { %1044 = vmatpush3.bf16.msra.mxu1 %v1367_v33  ;;  %1116 = vmatpush3.bf16.msra.mxu0 %v1367_v33  ;;  %v1500_v60 = vsub.f32 %v1396_v45, %v102_v51  ;;  %v1136_v61 = vpack.c.bf16 %v199_v19, %v192_v17  ;;  %v208_v62 = vand.u32 4294901760, %v207_v55  ;;  %v221_v63 = vsub.f32 %v1459_v20, %v220_v56 }
  0x3d   :  { %1045 = vmatprep.subr.bf16.mxu1 %v1269_v0  ;;  %1117 = vmatprep.subr.bf16.mxu0 %v1269_v0  ;;  %v234_v3 = vand.u32 4294901760, %v1475_v29  ;;  %v1064_v4 = vpack.c.bf16 %v201_v40, %v194_v36  ;;  %v215_v5 = vand.u32 4294901760, %v214_v57  ;;  %v241_v44 = vand.u32 4294901760, %v1480_v35 }
  0x3e   :  { %v1139_v45 = vpack.c.bf16 %v213_v34, %v206_v27  ;;  %v222_v50 = vand.u32 4294901760, %v221_v63  ;;  %v1142_v16 = vpack.c.bf16 %v227_v37, %v220_v56  ;;  %v1082_v55 = vpack.c.bf16 %v1379_v39, %v1377_v38 }
  0x3f   :  { %v235_v51 = vsub.f32 %v1475_v29, %v234_v3  ;;  %v1067_v10 = vpack.c.bf16 %v215_v5, %v208_v62  ;;  %v242_v14 = vsub.f32 %v1480_v35, %v241_v44 }
  0x40   :  { %1047 = vmatpush3.bf16.msra.mxu1 %v1391_v42  ;;  %1119 = vmatpush3.bf16.msra.mxu0 %v1391_v42 }
  0x41   :  { %1048 = vmatprep.subr.bf16.mxu1 %v1269_v0  ;;  %1120 = vmatprep.subr.bf16.mxu0 %v1269_v0  ;;  %v236_v17 = vand.u32 4294901760, %v235_v51 }
  0x44   :  { %1050 = vmatpush3.bf16.msra.mxu1 %v1416_v54  ;;  %1122 = vmatpush3.bf16.msra.mxu0 %v1416_v54 }
  0x45   :  { %1051 = vmatprep.subr.bf16.mxu1 %v1269_v0  ;;  %1123 = vmatprep.subr.bf16.mxu0 %v1269_v0 }
  0x48   :  { %1053 = vmatpush3.bf16.msra.mxu1 %v1437_v2  ;;  %1125 = vmatpush3.bf16.msra.mxu0 %v1437_v2 }
  0x49   :  { %1054 = vmatprep.subr.bf16.mxu1 %v1269_v0  ;;  %1126 = vmatprep.subr.bf16.mxu0 %v1269_v0 }
  0x4b   :  { %853 = vmatmul.mubr.f32.vlgmr.msra.gmra.mrb[0].mxu1 %v141_v9  ;;  %958 = vmatmul.mubr.f32.vlgmr.msra.gmra.mrb[0].mxu0 %v139_v52  ;;  %v1061_v52 = vpack.c.bf16 %v187_v26, %v180_v24  ;;  %v248_v9 = vand.u32 4294901760, %v1495_v43 }
  0x4c   :  { %1056 = vmatpush3.bf16.msra.mxu1 %v1055_v15  ;;  %1128 = vmatpush3.bf16.msra.mxu0 %v1127_v8  ;;  %v228_v8 = vsub.f32 %v1464_v22, %v227_v37  ;;  %v255_v15 = vand.u32 4294901760, %v1500_v60 }
  0x4d   :  { %1057 = vmatprep.subr.bf16.mxu1 %v1269_v0  ;;  %1129 = vmatprep.subr.bf16.mxu0 %v1269_v0  ;;  %v249_v24 = vsub.f32 %v1495_v43, %v248_v9 }
  0x4e   :  { %887 = vmatprep.mubr.msk.f32.mxu1 %vm1270_vm0, %v1271_v1  ;;  %992 = vmatprep.mubr.msk.f32.mxu0 %vm1270_vm0, %v1271_v1  ;;  %v229_v11 = vand.u32 4294901760, %v228_v8  ;;  %v256_v26 = vsub.f32 %v1500_v60, %v255_v15 }
  0x4f   :  { %v250_v47 = vand.u32 4294901760, %v249_v24 }
  0x50   :  { %1059 = vmatpush3.bf16.msra.mxu1 %v1058_v46  ;;  %1131 = vmatpush3.bf16.msra.mxu0 %v1130_v23  ;;  %v1070_v19 = vpack.c.bf16 %v229_v11, %v222_v50  ;;  %v243_v23 = vand.u32 4294901760, %v242_v14  ;;  %v1145_v46 = vpack.c.bf16 %v241_v44, %v234_v3  ;;  %v257_v28 = vand.u32 4294901760, %v256_v26 }
  0x51   :  { %1060 = vmatprep.subr.bf16.mxu1 %v1269_v0  ;;  %1132 = vmatprep.subr.bf16.mxu0 %v1269_v0 }
  0x52   :  { %v1073_v27 = vpack.c.bf16 %v243_v23, %v236_v17  ;;  %v1076_v34 = vpack.c.bf16 %v257_v28, %v250_v47 }
  0x54   :  { %1062 = vmatpush3.bf16.msra.mxu1 %v1061_v52  ;;  %1134 = vmatpush3.bf16.msra.mxu0 %v1133_v53  ;;  %v1148_v52 = vpack.c.bf16 %v255_v15, %v248_v9  ;;  %v1079_v53 = vpack.c.bf16 %v1363_v32, %v1359_v30  ;;  %v1085_v30 = vpack.c.bf16 %v1404_v49, %v1402_v48 }
  0x55   :  { %1063 = vmatprep.subr.bf16.mxu1 %v1269_v0  ;;  %1135 = vmatprep.subr.bf16.mxu0 %v1269_v0 }
  0x58   :  { %1065 = vmatpush3.bf16.msra.mxu1 %v1064_v4  ;;  %1137 = vmatpush3.bf16.msra.mxu0 %v1136_v61 }
  0x59   :  { %1066 = vmatprep.subr.bf16.mxu1 %v1269_v0  ;;  %1138 = vmatprep.subr.bf16.mxu0 %v1269_v0 }
  0x5c   :  { %1068 = vmatpush3.bf16.msra.mxu1 %v1067_v10  ;;  %1140 = vmatpush3.bf16.msra.mxu0 %v1139_v45 }
  0x5d   :  { %1069 = vmatprep.subr.bf16.mxu1 %v1269_v0  ;;  %1141 = vmatprep.subr.bf16.mxu0 %v1269_v0 }
  0x60   :  { %1071 = vmatpush3.bf16.msra.mxu1 %v1070_v19  ;;  %1143 = vmatpush3.bf16.msra.mxu0 %v1142_v16 }
  0x61   :  { %1072 = vmatprep.subr.bf16.mxu1 %v1269_v0  ;;  %1144 = vmatprep.subr.bf16.mxu0 %v1269_v0 }
  0x64   :  { %1074 = vmatpush3.bf16.msra.mxu1 %v1073_v27  ;;  %1146 = vmatpush3.bf16.msra.mxu0 %v1145_v46 }
  0x65   :  { %1075 = vmatprep.subr.bf16.mxu1 %v1269_v0  ;;  %1147 = vmatprep.subr.bf16.mxu0 %v1269_v0 }
  0x68   :  { %1077 = vmatpush3.bf16.msra.mxu1 %v1076_v34  ;;  %1149 = vmatpush3.bf16.msra.mxu0 %v1148_v52 }
  0x69   :  { %1078 = vmatprep.subr.bf16.mxu1 %v1269_v0  ;;  %1150 = vmatprep.subr.bf16.mxu0 %v1269_v0 }
  0x6b   :  { %888 = vmatmul.mubr.f32.vlgmr.msra.gmra.mrb[0].mxu1 %v1361_v31  ;;  %993 = vmatmul.mubr.f32.vlgmr.msra.gmra.mrb[0].mxu0 %v1361_v31 }
  0x6c   :  { %1080 = vmatpush3.bf16.msra.mxu1 %v1079_v53  ;;  %1152 = vmatpush3.bf16.msra.mxu0 %v1325_v12  ;;  %v1088_v12 = vpack.c.bf16 %v1425_v59, %v1423_v58 }
  0x6d   :  { %1081 = vmatprep.subr.bf16.mxu1 %v1269_v0  ;;  %1153 = vmatprep.subr.bf16.mxu0 %v1269_v0 }
  0x6e   :  { %922 = vmatprep.mubr.msk.f32.mxu1 %vm1270_vm0, %v1271_v1  ;;  %1027 = vmatprep.mubr.msk.f32.mxu0 %vm1270_vm0, %v1271_v1  ;;  %v1091_v1 = vpack.c.bf16 %v1446_v7, %v1443_v6 }
  0x70   :  { %1083 = vmatpush3.bf16.msra.mxu1 %v1082_v55  ;;  %1155 = vmatpush3.bf16.msra.mxu0 %v1329_v13  ;;  %v1094_v13 = vpack.c.bf16 %v1464_v22, %v1459_v20 }
  0x71   :  { %1084 = vmatprep.subr.bf16.mxu1 %v1269_v0  ;;  %1156 = vmatprep.subr.bf16.mxu0 %v1269_v0 }
  0x74   :  { %1086 = vmatpush3.bf16.msra.mxu1 %v1085_v30  ;;  %1158 = vmatpush3.bf16.msra.mxu0 %v1335_v18  ;;  %v1097_v18 = vpack.c.bf16 %v1480_v35, %v1475_v29 }
  0x75   :  { %1087 = vmatprep.subr.bf16.mxu1 %v1269_v0  ;;  %1159 = vmatprep.subr.bf16.mxu0 %v1269_v0 }
  0x78   :  { %1089 = vmatpush3.bf16.msra.mxu1 %v1088_v12  ;;  %1161 = vmatpush3.bf16.msra.mxu0 %v1349_v25  ;;  %v1100_v25 = vpack.c.bf16 %v1500_v60, %v1495_v43 }
  0x79   :  { %1090 = vmatprep.subr.bf16.mxu1 %v1269_v0  ;;  %1162 = vmatprep.subr.bf16.mxu0 %v1269_v0 }
  0x7c   :  { %1092 = vmatpush3.bf16.msra.mxu1 %v1091_v1  ;;  %1164 = vmatpush3.bf16.msra.mxu0 %v1367_v33 }
  0x7d   :  { %1093 = vmatprep.subr.bf16.mxu1 %v1269_v0  ;;  %1165 = vmatprep.subr.bf16.mxu0 %v1269_v0 }
  0x80   :  { %1095 = vmatpush3.bf16.msra.mxu1 %v1094_v13  ;;  %1167 = vmatpush3.bf16.msra.mxu0 %v1391_v42 }
  0x81   :  { %1096 = vmatprep.subr.bf16.mxu1 %v1269_v0  ;;  %1168 = vmatprep.subr.bf16.mxu0 %v1269_v0 }
  0x84   :  { %1098 = vmatpush3.bf16.msra.mxu1 %v1097_v18  ;;  %1170 = vmatpush3.bf16.msra.mxu0 %v1416_v54 }
  0x85   :  { %1099 = vmatprep.subr.bf16.mxu1 %v1269_v0  ;;  %1171 = vmatprep.subr.bf16.mxu0 %v1269_v0 }
  0x88   :  { %1101 = vmatpush3.bf16.msra.mxu1 %v1100_v25  ;;  %1173 = vmatpush3.bf16.msra.mxu0 %v1437_v2 }
  0x8b   :  { %923 = vmatmul.mubr.f32.vlgmr.msra.gmra.mrb[0].mxu1 %v1383_v41  ;;  %1028 = vmatmul.mubr.f32.vlgmr.msra.gmra.mrb[0].mxu0 %v1361_v31 }
 0x15e   :  { %v398_v32 = vpop.f32.mrb[0].mxu1  ;;  %v693_v33 = vpop.f32.mrb[0].mxu0 }
 0x15f   :  { %v1174_v38 = vadd.f32 %v693_v33, %v398_v32  ;;  %v924_v39 = vpop.f32.mrb[1].mxu1  ;;  %v1029_v42 = vpop.f32.mrb[1].mxu0 }
 0x161   :  { %v697_v48 = vmax.f32 %v1174_v38, 1e-24 }
 0x163   :  { %1191 = vrsqrt.f32 %v697_v48 }
 0x16d   :  { %v1192_v49 = vpop.eup %1191 }
 0x16e   :  { %v699_v54 = vmul.f32 5.656854, %v1192_v49 }
 0x170   :  { %v700_v0 = vmul.f32 %v699_v54, %v1337_v21 }
 0x172   :  { %701 = vst [vmem:[#allocation7] sm:$0xf] %v700_v0 }
 0x173   :  { %1248 = shalt.err (!%p1245_p6)
}
 0x174   :  { %s1249_s10 = scalar_lea.hbm %s1585_s2, 64 }
 0x175   :  { %p1250_p7 = scmp.ne.s32.totalorder %s1585_s2, %s1249_s10  ;;  %p1253_p8 = scmp.lt.u32.totalorder %s1249_s10, %s1585_s2 }
 0x177   :  { %p1255_p9 = pnand %p1253_p8, %p1250_p7 }
 0x179   :  { %1258 = shalt.err (!%p1255_p9)
}
 0x17a   :  { %711 = dma.vmem_to_hbm [thread:$0]  %s709_s6, 64, %s1585_s2, [#allocation4]  }
 0x17b   :  { %1263 = dma.done.wait [#allocation4], 64  }
 0x17c   :  { %1264 = vsyncadd [#allocation4], 4294967232 }
 0x17d   :  { %715 = vsyncpa [#allocation3], 1 }
 0x17e   :  { %716 = vsyncpa [#allocation6], 1 }
 0x17f   :  { %717 = vsyncpa [#allocation4], 1 }

</bundles_post_ra>
